<compile_context>
chip_gen: v7x
topology: tpu7x:2x2x1
jax: 0.10.0
libtpu: 0.0.40
codegen_flags: <defaults>
</compile_context>

<pallas_src>
import functools
import math

import jax
import jax.numpy as jnp
from jax.experimental import pallas as pl
from jax.experimental.pallas import tpu as pltpu

_EPS = 1e-5
_LANES = 128
_MAX_FOLD_WIDTH = 512              # max folded lane width lcm(C,128); keeps the group matmul cheap
_VMEM_TILE_BUDGET = 8 * 1024 * 1024   # bytes for the double-buffered streaming in/out blocks
_MAX_TILE_ROWS = 2048


def _round_up(n, m):
    return ((n + m - 1) // m) * m


def _cdiv(a, b):
    return (a + b - 1) // b


def _pick_tile_rows(width_elems, in_itemsize, out_itemsize, n_rows):
    """Row tile: largest multiple of 8 under the VMEM budget, capped so the grid
    has >= ~4 blocks (megacore split on v7x).  For tiny inputs, one full block."""
    if n_rows <= 8:
        return max(1, n_rows)          # block dim == full array dim -> always legal
    # Only the double-buffered in/out blocks (plus ~one f32 temp) live in VMEM.
    per_row = width_elems * (2 * in_itemsize + 2 * out_itemsize + 4)
    tile = _VMEM_TILE_BUDGET // per_row
    tile = min(tile, _MAX_TILE_ROWS)
    tile = min(tile, _round_up(_cdiv(n_rows, 4), 8))     # >= 4 grid blocks when possible
    tile = max(8, (tile // 8) * 8)
    return tile


def _vmem_limit(in_block, out_block, const_bytes, temp_bytes):
    limit = 2 * (in_block + out_block) + 2 * const_bytes + temp_bytes + 8 * 1024 * 1024
    return int(min(limit, 48 * 1024 * 1024))             # headroom-safe on v7x (64 MiB/TC)


# ----------------------------------------------------------------------------
# Kernels
# ----------------------------------------------------------------------------
def _biasfree_folded_kernel(x_ref, w_ref, m_ref, o_ref, *, inv_c, c_eps):
    """Lane-folded path: x_ref is (tile, W) with G = W/C logical rows per lane row.

    m_ref is the exact 0/1 block-diagonal (W, W) group matrix; the matmul both
    group-reduces and broadcasts the statistic back to every lane of the group.
    sqrt(C) is pre-folded into w_ref, C*eps into c_eps, so the only full-width
    VALU work is: 1/C scale, center, square, +eps, and two output muls.
    """
    x_raw = x_ref[...]
    x = x_raw.astype(jnp.float32)
    m = m_ref[...]
    x_mm = x if m.dtype == jnp.float32 else x_raw.astype(m.dtype)
    # group mean, broadcast to all lanes of the group (stable two-pass variance)
    mu = jnp.dot(x_mm, m, preferred_element_type=jnp.float32) * inv_c
    xc = x - mu
    sq = xc * xc
    sq_mm = sq if m.dtype == jnp.float32 else sq.astype(m.dtype)
    s2 = jnp.dot(sq_mm, m, preferred_element_type=jnp.float32)     # group sum of xc^2
    inv = jax.lax.rsqrt(s2 + c_eps)          # == rsqrt(var + eps) / sqrt(C); sqrt(C) lives in w
    o_ref[...] = (x * inv * w_ref[...]).astype(o_ref.dtype)        # mean NOT subtracted (BiasFree)


def _biasfree_rows_kernel(x_ref, w_ref, o_ref, *, eps):
    """Generic path: x_ref is (tile, C), one logical row per sublane row."""
    x = x_ref[...].astype(jnp.float32)
    mu = jnp.mean(x, axis=-1, keepdims=True)
    xc = x - mu
    var = jnp.mean(xc * xc, axis=-1, keepdims=True)      # unbiased=False
    inv = jax.lax.rsqrt(var + eps)
    o_ref[...] = (x * inv * w_ref[...]).astype(o_ref.dtype)        # mean NOT subtracted (BiasFree)


# ----------------------------------------------------------------------------
# Wrapper
# ----------------------------------------------------------------------------
@jax.jit
def bias_free_layer_norm(x, weight):
    """BiasFree LayerNorm over the last axis.  x: (..., C), weight: (C,)."""
    orig_shape = x.shape
    C = orig_shape[-1]
    total = math.prod(orig_shape)
    rows = total // C
    in_b = x.dtype.itemsize
    out_b = in_b
    w32 = weight.reshape(-1).astype(jnp.float32)

    compiler_semantics = ("parallel",)     # shards the row grid across v7x's 2 TCs

    # Lane-fold decision: fold G = W/C logical rows into one W-lane row, where
    # W = lcm(C, 128).  Only taken when the fold is a *free* reshape (no pad).
    W = (C * _LANES) // math.gcd(C, _LANES)
    use_fold = (C % _LANES != 0) and (W <= _MAX_FOLD_WIDTH) and total > 0 and (total % W == 0)

    if use_fold:
        G = W // C
        r2 = total // W
        xf = x.reshape(r2, W)                              # free (row-major contiguous) reshape
        tile = _pick_tile_rows(W, in_b, out_b, r2)
        grid = (_cdiv(r2, tile),)                          # ragged last block is masked by Pallas

        # bf16 group matrix (exact 0/1) + bf16 operands only when the input is
        # already bf16: single-pass MXU with no extra precision loss.  f32 inputs
        # keep the (emulated) f32 matmul to preserve full accuracy.
        mm_dtype = jnp.bfloat16 if x.dtype == jnp.bfloat16 else jnp.float32
        group = jnp.arange(W, dtype=jnp.int32) // C
        m = (group[:, None] == group[None, :]).astype(mm_dtype)   # block-diagonal 0/1
        # sqrt(C) folded into the per-channel weight; C*eps folded into the epsilon.
        w_tiled = jnp.tile(w32 * float(math.sqrt(C)), G).reshape(1, W)

        in_block = tile * W * in_b
        out_block = tile * W * out_b
        const_bytes = W * W * jnp.dtype(mm_dtype).itemsize + W * 4
        limit = _vmem_limit(in_block, out_block, const_bytes, 4 * tile * W * 4)

        cost = pl.CostEstimate(
            flops=int(total * (6 + 4 * W)),               # elementwise + two (·,W)@(W,W) matmuls
            transcendentals=int(total),                   # rsqrt at full width
            bytes_accessed=int(total * (in_b + out_b) + const_bytes),
        )

        out = pl.pallas_call(
            functools.partial(_biasfree_folded_kernel,
                              inv_c=1.0 / C, c_eps=float(C) * _EPS),
            out_shape=jax.ShapeDtypeStruct((r2, W), x.dtype),
            grid_spec=pltpu.PrefetchScalarGridSpec(
                num_scalar_prefetch=0,
                grid=grid,
                in_specs=[
                    pl.BlockSpec((tile, W), lambda i: (i, 0)),
                    pl.BlockSpec((1, W), lambda i: (0, 0)),      # constant block (hoisted)
                    pl.BlockSpec((W, W), lambda i: (0, 0)),      # constant block (hoisted)
                ],
                out_specs=pl.BlockSpec((tile, W), lambda i: (i, 0)),
            ),
            compiler_params=pltpu.CompilerParams(
                dimension_semantics=compiler_semantics,
                vmem_limit_bytes=limit,
            ),
            cost_estimate=cost,
        )(xf, w_tiled, m)
        return out.reshape(orig_shape)

    # Generic path: one logical row per sublane row, full C on lanes.
    # (C % 128 == 0 is already lane-dense; other fallbacks accept masked lane tails.)
    x2 = x.reshape(rows, C)
    tile = _pick_tile_rows(C, in_b, out_b, rows)
    grid = (_cdiv(rows, tile),)                            # ragged last block masked, no pad/slice
    in_block = tile * C * in_b
    out_block = tile * C * out_b
    limit = _vmem_limit(in_block, out_block, C * 4, 4 * tile * C * 4)

    cost = pl.CostEstimate(
        flops=int(total * 8),
        transcendentals=int(rows),
        bytes_accessed=int(total * (in_b + out_b) + C * 4),
    )

    out = pl.pallas_call(
        functools.partial(_biasfree_rows_kernel, eps=_EPS),
        out_shape=jax.ShapeDtypeStruct((rows, C), x.dtype),
        grid_spec=pltpu.PrefetchScalarGridSpec(
            num_scalar_prefetch=0,
            grid=grid,
            in_specs=[
                pl.BlockSpec((tile, C), lambda i: (i, 0)),
                pl.BlockSpec((1, C), lambda i: (0, 0)),          # constant block (hoisted)
            ],
            out_specs=pl.BlockSpec((tile, C), lambda i: (i, 0)),
        ),
        compiler_params=pltpu.CompilerParams(
            dimension_semantics=compiler_semantics,
            vmem_limit_bytes=limit,
        ),
        cost_estimate=cost,
    )(x2, w32.reshape(1, C))
    return out.reshape(orig_shape)


# ----------------------------------------------------------------------------
# Reference + self-test
# ----------------------------------------------------------------------------
def _ref_bias_free_layer_norm(x, weight):
    x32 = x.astype(jnp.float32)
    var = jnp.var(x32, axis=-1, keepdims=True)             # ddof=0 == unbiased=False
    y = x32 / jnp.sqrt(var + _EPS) * weight.astype(jnp.float32)
    return y.astype(x.dtype)


if __name__ == "__main__":
    key = jax.random.PRNGKey(0)
    k1, k2, k3, k4, kw1, kw2, kw3, kw4 = jax.random.split(key, 8)
    failures = []

    def check(name, x, w, atol, rtol):
        out = jax.block_until_ready(bias_free_layer_norm(x, w))
        ref = _ref_bias_free_layer_norm(x, w)
        o32 = out.astype(jnp.float32)
        r32 = ref.astype(jnp.float32)
        if not jnp.allclose(o32, r32, atol=atol, rtol=rtol):
            failures.append(f"{name}: max abs err = {float(jnp.max(jnp.abs(o32 - r32)))}")

    # Case 1: (B, HW, C) with C=32 (divides 128) -> lane-folded W=128 path.
    x1 = jax.random.normal(k1, (2, 64, 32), dtype=jnp.float32)
    w1 = jnp.ones((32,), jnp.float32) + 0.01 * jax.random.normal(kw1, (32,), jnp.float32)
    check("folded W=128", x1, w1, atol=2e-4, rtol=2e-4)

    # Case 2: C=48 (does NOT divide 128) -> generalized fold to W=lcm(48,128)=384.
    x2 = jax.random.normal(k2, (2, 64, 48), dtype=jnp.float32)
    w2 = jnp.ones((48,), jnp.float32) + 0.01 * jax.random.normal(kw2, (48,), jnp.float32)
    check("folded W=384", x2, w2, atol=2e-4, rtol=2e-4)

    # Case 3: ragged rows (15) + C=160 (lcm too large) -> generic path, masked last block, no pad.
    x3 = jax.random.normal(k3, (3, 5, 160), dtype=jnp.float32)
    w3 = jnp.ones((160,), jnp.float32) + 0.01 * jax.random.normal(kw3, (160,), jnp.float32)
    check("generic ragged", x3, w3, atol=2e-4, rtol=2e-4)

    # Case 4: bf16 input -> folded path with single-pass bf16 MXU group sums.
    x4 = jax.random.normal(k4, (2, 64, 32), dtype=jnp.float32).astype(jnp.bfloat16)
    w4 = (jnp.ones((32,), jnp.float32)
          + 0.01 * jax.random.normal(kw4, (32,), jnp.float32)).astype(jnp.bfloat16)
    check("folded bf16", x4, w4, atol=5e-2, rtol=5e-2)

    if failures:
        for f in failures:
            print("MISMATCH", f)
    else:
        print("KERNEL_OK")
</pallas_src>

<mosaic_0001>
module attributes {stable_mosaic.version = 11 : i64} {
  func.func @_biasfree_folded_kernel(%arg0: i32, %arg1: memref<8x128xf32, #tpu.memory_space<vmem>>, %arg2: memref<1x128xf32, #tpu.memory_space<vmem>>, %arg3: memref<128x128xf32, #tpu.memory_space<vmem>>, %arg4: memref<8x128xf32, #tpu.memory_space<vmem>>) attributes {dimension_semantics = [#tpu.dimension_semantics<parallel>], iteration_bounds = array<i64: 4>, scalar_prefetch = 0 : i64, scratch_operands = 0 : i64, tpu.core_type = #tpu.core_type<tc>, window_params = [{transform_indices = @transform_0, window_bounds = array<i64: 8, 128>}, {pipeline_mode = #tpu.pipeline_mode<synchronous>, transform_indices = @transform_1, window_bounds = array<i64: 1, 128>}, {pipeline_mode = #tpu.pipeline_mode<synchronous>, transform_indices = @transform_2, window_bounds = array<i64: 128, 128>}, {transform_indices = @transform_3, window_bounds = array<i64: 8, 128>}]} {
    %c0 = arith.constant 0 : index
    %c0_0 = arith.constant 0 : index
    %0 = vector.load %arg1[%c0, %c0_0] : memref<8x128xf32, #tpu.memory_space<vmem>>, vector<8x128xf32>
    %c0_1 = arith.constant 0 : index
    %c0_2 = arith.constant 0 : index
    %1 = vector.load %arg3[%c0_1, %c0_2] : memref<128x128xf32, #tpu.memory_space<vmem>>, vector<128x128xf32>
    %cst = arith.constant dense<0.000000e+00> : vector<8x128xf32>
    %2 = tpu.matmul %0, %1, %cst {dimension_numbers = #tpu.dot_dimension_numbers<[1], [0], [0], [1], [0, 0, 1, 1], [], []>} : vector<8x128xf32>, vector<128x128xf32>, vector<8x128xf32> -> vector<8x128xf32>
    %cst_3 = arith.constant 3.125000e-02 : f32
    %3 = vector.broadcast %cst_3 : f32 to vector<8x128xf32>
    %4 = arith.mulf %2, %3 : vector<8x128xf32>
    %5 = arith.subf %0, %4 : vector<8x128xf32>
    %6 = arith.mulf %5, %5 : vector<8x128xf32>
    %cst_4 = arith.constant dense<0.000000e+00> : vector<8x128xf32>
    %7 = tpu.matmul %6, %1, %cst_4 {dimension_numbers = #tpu.dot_dimension_numbers<[1], [0], [0], [1], [0, 0, 1, 1], [], []>} : vector<8x128xf32>, vector<128x128xf32>, vector<8x128xf32> -> vector<8x128xf32>
    %cst_5 = arith.constant 3.200000e-04 : f32
    %8 = vector.broadcast %cst_5 : f32 to vector<8x128xf32>
    %9 = arith.addf %7, %8 : vector<8x128xf32>
    %10 = math.rsqrt %9 : vector<8x128xf32>
    %11 = arith.mulf %0, %10 : vector<8x128xf32>
    %c0_6 = arith.constant 0 : index
    %c0_7 = arith.constant 0 : index
    %12 = vector.load %arg2[%c0_6, %c0_7] : memref<1x128xf32, #tpu.memory_space<vmem>>, vector<1x128xf32>
    %13 = vector.broadcast %12 : vector<1x128xf32> to vector<8x128xf32>
    %14 = arith.mulf %11, %13 : vector<8x128xf32>
    %c0_8 = arith.constant 0 : index
    %c0_9 = arith.constant 0 : index
    %15 = vector.load %arg4[%c0_8, %c0_9] : memref<8x128xf32, #tpu.memory_space<vmem>>, vector<8x128xf32>
    tpu.vector_store %arg4[%c0_8, %c0_9], %14 {strides = array<i32>} : memref<8x128xf32, #tpu.memory_space<vmem>>, vector<8x128xf32>,
    return
  }
  func.func @transform_0(%arg0: i32) -> (i32, i32) {
    %c0_i32 = arith.constant 0 : i32
    %c0_i32_0 = arith.constant 0 : i32
    return %arg0, %c0_i32 : i32, i32
  }
  func.func @transform_1(%arg0: i32) -> (i32, i32) {
    %c0_i32 = arith.constant 0 : i32
    %c0_i32_0 = arith.constant 0 : i32
    %c0_i32_1 = arith.constant 0 : i32
    return %c0_i32, %c0_i32_0 : i32, i32
  }
  func.func @transform_2(%arg0: i32) -> (i32, i32) {
    %c0_i32 = arith.constant 0 : i32
    %c0_i32_0 = arith.constant 0 : i32
    %c0_i32_1 = arith.constant 0 : i32
    return %c0_i32, %c0_i32_0 : i32, i32
  }
  func.func @transform_3(%arg0: i32) -> (i32, i32) {
    %c0_i32 = arith.constant 0 : i32
    %c0_i32_0 = arith.constant 0 : i32
    return %arg0, %c0_i32 : i32, i32
  }
}

</mosaic_0001>

<bundles_post_ra>
// kernel: tile.8
= control target key start
LH: loop header
LB: loop body
LE: loop exit
PB: predicated region body
PF: predicated region fallthrough
CT: control target
= control target key end

     0   :  { %s22_s0 = inlined_call_operand.vmem [shape: f32[32], index: 0, kind: input, shape index: {}]   ;;  %s23_s1 = inlined_call_operand.vmem [shape: f32[4,32], index: 1, kind: output, shape index: {}]  }
   0x1   :  { %v4_v0 = vld [vmem:[%s22_s0] ss:$0 sm:$0xff] }
   0x2   :  { %5 = vst [vmem:[%s23_s1] sm:$0xf] %v4_v0 }

// kernel: tile.9
= control target key start
LH: loop header
LB: loop body
LE: loop exit
PB: predicated region body
PF: predicated region fallthrough
CT: control target
= control target key end

     0   :  { %vm7_vm0 = vcmask 261120   ;;  %s37_s8 = smov 32   ;;  %s38_s9 = smov 64   ;;  %vm13_vm1 = vcmask 1048320   ;;  %vm19_vm2 = vcmask 785920   ;;  %vm25_vm3 = vcmask 523520   ;;  %s55_s0 = inlined_call_operand.vmem [shape: f32[4,32], index: 0, kind: input, shape index: {}]   ;;  %s56_s1 = inlined_call_operand.vmem [shape: f32[1,128], index: 1, kind: output, shape index: {}]  }
   0x1   :  { %v4_v0 = vld [vmem:[%s55_s0] sm:$0xf]  ;;  %s36_s0 = smov 96  }
   0x2   :  { %5 = vst [vmem:[#allocation1] sm:$0xf] %v4_v0 }
   0x9   :  { %v10_v1 = vld [vmem:[#allocation1 + $0x3] sm:$0x1]   ;;  %v22_v2 = vld [vmem:[#allocation1 + $0x1] sm:$0x1]   ;;  %v6_v3 = vld [vmem:[#allocation1] sm:$0x1]  }
   0xa   :  { %11 = vrot.lane.b32.xlu0 %v10_v1, %s36_s0  ;;  %23 = vrot.lane.b32.xlu1 %v22_v2, %s37_s8  ;;  %v16_v4 = vld [vmem:[#allocation1 + $0x2] sm:$0x1]   ;;  %8 = vst.msk [vmem:[#allocation0] sm:$0x1] %vm7_vm0, %v6_v3  }
   0xe   :  { %17 = vrot.lane.b32.xlu0 %v16_v4, %s38_s9 }
  0x7c   :  { %v12_v5 = vpop.permute.xlu0 %11   ;;  %v24_v6 = vpop.permute.xlu1 %23  }
  0x7d   :  { %14 = vst.msk [vmem:[#allocation0] sm:$0x1] %vm13_vm1, %v12_v5  }
  0x80   :  { %v18_v7 = vpop.permute.xlu0 %17  }
  0x81   :  { %20 = vst.msk [vmem:[#allocation0] sm:$0x1] %vm19_vm2, %v18_v7  }
  0x82   :  { %26 = vst.msk [vmem:[#allocation0] sm:$0x1] %vm25_vm3, %v24_v6  }
  0x89   :  { %v30_v8 = vld [vmem:[#allocation0] sm:$0x1] }
  0x8a   :  { %32 = vst [vmem:[%s56_s1] sm:$0x1] %v30_v8 }

// kernel: bias_free_layer_norm.1
= control target key start
LH: loop header
LB: loop body
LE: loop exit
PB: predicated region body
PF: predicated region fallthrough
CT: control target
= control target key end

     0   :  { %s596_s12 = smov 0   ;;  %s671_s0 = inlined_call_operand.vmem [shape: f32[32,128], index: 0, kind: input, shape index: {}]   ;;  %s672_s1 = inlined_call_operand.vmem [shape: f32[1,128], index: 1, kind: input, shape index: {}]   ;;  %s673_s2 = inlined_call_operand.vmem [shape: f32[128,128], index: 2, kind: input, shape index: {}]   ;;  %s674_s3 = inlined_call_operand.vmem [shape: f32[32,128], index: 3, kind: output, shape index: {}]  }
   0x1 LB: > { %s390_s13 = sadd.s32 4294967295, %s571_s12   ;;  %p394_p0 = scmp.ge.s32.totalorder %s571_s12, 1  ;;  %s571_s12 = sphi %s596_s12, %s13_s12  }
   0x2   : > { %p136_p1 = scmp.lt.s32.totalorder %s571_s12, 5 }
   0x4   : > { %p137_p2 = pnand %p394_p0, %p136_p1 }
   0x5   : > { %v167_v0 = vld [vmem:[%s673_s2] sm:$0xff] (!%p137_p2)  ;;  %v168_v1 = vld [vmem:[%s673_s2 + $0x8] sm:$0xff] (!%p137_p2)  ;;  %v169_v2 = vld [vmem:[%s673_s2 + $0x10] sm:$0xff] (!%p137_p2)  ;;  %v573_v3 = vmov (!%p137_p2), 0.0|0.0   ;;  %vm574_vm0 = vmmov (!%p137_p2), 0   ;;  %v575_v6 = vmov (!%p137_p2), 0.0  }
   0x6   : > { %140 = sbr.rel (%p137_p2) target bundleno = 487 (0x1e7), region = 32  ;;  %504 = vmatprep.subr.bf16.mxu0 (!%p137_p2), %v573_v3  ;;  %v505_v4 = vpack.c.bf16 (!%p137_p2), %v168_v1, %v167_v0  ;;  %v170_v5 = vld [vmem:[%s673_s2 + $0x18] sm:$0xff] (!%p137_p2)  ;;  %466 = vmatprep.mubr.msk.f32.mxu0 (!%p137_p2), %vm574_vm0, %v575_v6  ;;  %v171_v8 = vld [vmem:[%s673_s2 + $0x20] sm:$0xff] (!%p137_p2)  ;;  %v172_v9 = vld [vmem:[%s673_s2 + $0x28] sm:$0xff] (!%p137_p2)  ;;  %p158_p3 = scmp.lt.s32.totalorder (!%p137_p2), %s390_s13, 3 }
   0x7   : > { %528 = vmatprep.subr.bf16.mxu1 (!%p137_p2), %v573_v3  ;;  %501 = vmatprep.mubr.msk.f32.mxu1 (!%p137_p2), %vm574_vm0, %v575_v6  ;;  %v508_v7 = vpack.c.bf16 (!%p137_p2), %v170_v5, %v169_v2  ;;  %v511_v10 = vpack.c.bf16 (!%p137_p2), %v172_v9, %v171_v8  ;;  %v173_v11 = vld [vmem:[%s673_s2 + $0x30] sm:$0xff] (!%p137_p2)  ;;  %v174_v12 = vld [vmem:[%s673_s2 + $0x38] sm:$0xff] (!%p137_p2)  ;;  %v175_v14 = vld [vmem:[%s673_s2 + $0x40] sm:$0xff] (!%p137_p2) }
   0x8   : > { %506 = vmatpush3.bf16.msra.mxu0 (!%p137_p2), %v505_v4  ;;  %530 = vmatpush3.bf16.msra.mxu1 (!%p137_p2), %v505_v4  ;;  %v514_v13 = vpack.c.bf16 (!%p137_p2), %v174_v12, %v173_v11  ;;  %v176_v15 = vld [vmem:[%s673_s2 + $0x48] sm:$0xff] (!%p137_p2)  ;;  %v177_v17 = vld [vmem:[%s673_s2 + $0x50] sm:$0xff] (!%p137_p2)  ;;  %v178_v18 = vld [vmem:[%s673_s2 + $0x58] sm:$0xff] (!%p137_p2) }
   0x9   : > { %507 = vmatprep.subr.bf16.mxu0 (!%p137_p2), %v573_v3  ;;  %531 = vmatprep.subr.bf16.mxu1 (!%p137_p2), %v573_v3  ;;  %v517_v16 = vpack.c.bf16 (!%p137_p2), %v176_v15, %v175_v14  ;;  %v520_v19 = vpack.c.bf16 (!%p137_p2), %v178_v18, %v177_v17  ;;  %v179_v20 = vld [vmem:[%s673_s2 + $0x60] sm:$0xff] (!%p137_p2)  ;;  %v180_v21 = vld [vmem:[%s673_s2 + $0x68] sm:$0xff] (!%p137_p2)  ;;  %v181_v23 = vld [vmem:[%s673_s2 + $0x70] sm:$0xff] (!%p137_p2) }
   0xa   : > { %v523_v22 = vpack.c.bf16 (!%p137_p2), %v180_v21, %v179_v20  ;;  %v182_v24 = vld [vmem:[%s673_s2 + $0x78] sm:$0xff] (!%p137_p2)  ;;  %v397_v36 = vld [vmem:[%s672_s1] ss:$0 sm:$0xff] (!%p137_p2) }
   0xb   : > { %v526_v25 = vpack.c.bf16 (!%p137_p2), %v182_v24, %v181_v23 }
   0xc   : > { %509 = vmatpush3.bf16.msra.mxu0 (!%p137_p2), %v508_v7  ;;  %533 = vmatpush3.bf16.msra.mxu1 (!%p137_p2), %v508_v7 }
   0xd   : > { %510 = vmatprep.subr.bf16.mxu0 %v573_v3  ;;  %534 = vmatprep.subr.bf16.mxu1 %v573_v3  ;;  %s676_s13 = smov (!%p158_p3, %s390_s13), 3 }
   0xe   : > { %s395_s21 = sshll.u32 %s676_s13, 3 }
   0xf   : > { %s161_s24 = scalar_lea.vmem %s671_s0, %s395_s21  ;;  %s165_s28 = scalar_lea.vmem %s674_s3, %s395_s21 }
  0x10   : > { %512 = vmatpush3.bf16.msra.mxu0 %v511_v10  ;;  %536 = vmatpush3.bf16.msra.mxu1 %v511_v10  ;;  %v166_v26 = vld [vmem:[%s161_s24] sm:$0xff] }
  0x11   : > { %513 = vmatprep.subr.bf16.mxu0 %v573_v3  ;;  %537 = vmatprep.subr.bf16.mxu1 %v573_v3 }
  0x14   : > { %515 = vmatpush3.bf16.msra.mxu0 %v514_v13  ;;  %539 = vmatpush3.bf16.msra.mxu1 %v514_v13 }
  0x15   : > { %516 = vmatprep.subr.bf16.mxu0 %v573_v3  ;;  %540 = vmatprep.subr.bf16.mxu1 %v573_v3 }
  0x18   : > { %518 = vmatpush3.bf16.msra.mxu0 %v517_v16  ;;  %542 = vmatpush3.bf16.msra.mxu1 %v517_v16 }
  0x19   : > { %519 = vmatprep.subr.bf16.mxu0 %v573_v3  ;;  %543 = vmatprep.subr.bf16.mxu1 %v573_v3 }
  0x1c   : > { %521 = vmatpush3.bf16.msra.mxu0 %v520_v19  ;;  %545 = vmatpush3.bf16.msra.mxu1 %v520_v19 }
  0x1d   : > { %522 = vmatprep.subr.bf16.mxu0 %v573_v3  ;;  %546 = vmatprep.subr.bf16.mxu1 %v573_v3 }
  0x20   : > { %524 = vmatpush3.bf16.msra.mxu0 %v523_v22  ;;  %548 = vmatpush3.bf16.msra.mxu1 %v523_v22 }
  0x21   : > { %525 = vmatprep.subr.bf16.mxu0 %v573_v3  ;;  %549 = vmatprep.subr.bf16.mxu1 %v573_v3 }
  0x24   : > { %527 = vmatpush3.bf16.msra.mxu0 %v526_v25  ;;  %551 = vmatpush3.bf16.msra.mxu1 %v526_v25 }
  0x27   : > { %467 = vmatmul.mubr.f32.vlgmr.msra.gmra.mrb[0].mxu0 %v166_v26 }
  0xfa   : > { %v249_v27 = vpop.f32.mrb[0].mxu0 }
  0xfb   : > { %v253_v28 = vmul.f32 0.03125, %v249_v27  ;;  %v468_v29 = vpop.f32.mrb[1].mxu0 }
  0xfd   : > { %v254_v30 = vsub.f32 %v166_v26, %v253_v28 }
  0xff   : > { %v255_v31 = vmul.f32 %v254_v30, %v254_v30 }
 0x101   : > { %502 = vmatmul.mubr.f32.vlgmr.msra.gmra.mrb[0].mxu1 %v255_v31 }
 0x1d4   : > { %v322_v32 = vpop.f32.mrb[0].mxu1 }
 0x1d5   : > { %v323_v33 = vadd.f32 0.00032, %v322_v32  ;;  %v503_v34 = vpop.f32.mrb[1].mxu1 }
 0x1d7   : > { %563 = vrsqrt.f32 %v323_v33 }
 0x1e1   : > { %v564_v35 = vpop.eup %563 }
 0x1e2   : > { %v327_v37 = vmul.f32 %v564_v35, %v166_v26 }
 0x1e4   : > { %v335_v38 = vmul.f32 %v397_v36, %v327_v37 }
 0x1e6   : > { %336 = vst [vmem:[%s165_s28] sm:$0xff] %v335_v38 }
 0x1e7 PF: > { %s13_s12 = sadd.s32 1, %s571_s12  }
 0x1e8   : > { %p10_p4 = scmp.ge.s32.totalorder %s13_s12, 6  }
 0x1ea   :  { %12 = sbr.rel (!%p10_p4) target bundleno = 1 (0x1), region = 62 }

</bundles_post_ra>
